<compile_context>
chip_gen: v7x
topology: tpu7x:2x2x1
jax: 0.10.0
libtpu: 0.0.40
codegen_flags: <defaults>
</compile_context>

<pallas_src>
import functools

import jax
import jax.numpy as jnp
import numpy as np
from jax.experimental import pallas as pl
from jax.experimental.pallas import tpu as pltpu


def _conv_im2col_kernel(x_ref, w_ref, m_ref, b_ref, o_ref, *,
                        H, W, KH, KW, Cin, Cout, Gout, NB):
    # x_ref: (NB, Cin, H*W)       NB flattened images (lane dim = H*W)
    # w_ref: (Gout, KH*KW*Cin)    bf16 weights, Cout rows zero-padded to Gout
    # m_ref: (KH*KW*Cin, H*W)     f32 0/1 masks (implicit zero padding), per-tap,
    #                             pre-broadcast over channels
    # b_ref: (Gout, 1)            f32 bias, zero-padded to Gout rows
    # o_ref: (NB, Cout, H*W)      lane-dense output
    HW = H * W
    w = w_ref[...]                # read once; tiny, VMEM-resident
    m = m_ref[...]
    b = b_ref[...]

    for n in range(NB):                                   # unrolled at trace time
        x = x_ref[n]                                      # (Cin, HW) f32
        pieces = []
        for kh in range(KH):
            for kw in range(KW):
                s = (kh - KH // 2) * W + (kw - KW // 2)   # flat pixel shift
                # Output pixel f needs input pixel f + s  ==  lane roll by -s.
                p = x if s == 0 else pltpu.roll(x, shift=(-s) % HW, axis=1)
                pieces.append(p)
        # im2col-in-lanes: (KK*Cin, HW).  One whole-slab mask multiply zeroes
        # every read that crossed the image border (and any roll wrap-around);
        # single cast to bf16 right before the MXU.
        x_taps = (jnp.concatenate(pieces, axis=0) * m).astype(jnp.bfloat16)
        # One GEMM absorbs the 9-tap accumulation (K = KH*KW*Cin).
        out = jnp.dot(w, x_taps, preferred_element_type=jnp.float32) + b  # (Gout, HW)
        o_ref[n] = out[:Cout, :].astype(o_ref.dtype)


def _pick_block_n(N, max_nb=8):
    """Largest divisor of N (<= max_nb) that still leaves >= 2 grid steps."""
    best = 1
    for nb in range(1, min(max_nb, N) + 1):
        if N % nb == 0 and N // nb >= 2:
            best = nb
    return best


def last_layer_forward(x_nchw, weight, bias, kernel_size=3):
    """Forward pass of LastLayer (non-binary branch).

    x_nchw: (N, Cin, H, W)       -- PyTorch convention
    weight: (Cout, Cin, KH, KW)  -- PyTorch Conv2d weight layout
    bias:   (Cout,)
    returns (N, Cout, H, W)
    """
    N, Cin, H, W = x_nchw.shape
    Cout = weight.shape[0]
    KH = KW = kernel_size
    KK = KH * KW
    pad_h, pad_w = KH // 2, KW // 2
    HW = H * W
    Gout = ((Cout + 7) // 8) * 8      # pad output rows to a sublane tile
    NB = _pick_block_n(N)

    # Free (metadata-only) reshape: NCHW -> (N, Cin, H*W).  No transpose, no pad.
    x_flat = x_nchw.reshape(N, Cin, HW)

    # Weights: (Cout, Cin, KH, KW) -> (Gout, KK*Cin); column order = (tap, channel).
    w2 = jnp.transpose(weight, (0, 2, 3, 1)).reshape(Cout, KK * Cin)
    w2 = jnp.pad(w2, ((0, Gout - Cout), (0, 0))).astype(jnp.bfloat16)

    b_pad = jnp.pad(bias.reshape(Cout, 1),
                    ((0, Gout - Cout), (0, 0))).astype(jnp.float32)

    # Trace-time (numpy) 0/1 masks: row t*Cin+c, pixel f is 1 iff output pixel f
    # may read tap t (the shifted read stays inside the image).  Pre-broadcast
    # over channels so the kernel applies them with a single multiply.
    masks_np = np.zeros((KK * Cin, HW), np.float32)
    for kh in range(KH):
        for kw in range(KW):
            dh, dk = kh - pad_h, kw - pad_w
            m2d = np.zeros((H, W), np.float32)
            m2d[max(0, -dh):min(H, H - dh), max(0, -dk):min(W, W - dk)] = 1.0
            t = kh * KW + kw
            masks_np[t * Cin:(t + 1) * Cin, :] = m2d.reshape(1, HW)
    masks = jnp.asarray(masks_np)

    kernel = functools.partial(_conv_im2col_kernel, H=H, W=W, KH=KH, KW=KW,
                               Cin=Cin, Cout=Cout, Gout=Gout, NB=NB)

    out_flat = pl.pallas_call(
        kernel,
        out_shape=jax.ShapeDtypeStruct((N, Cout, HW), x_nchw.dtype),
        grid_spec=pltpu.PrefetchScalarGridSpec(
            num_scalar_prefetch=0,
            grid=(N // NB,),
            in_specs=[
                pl.BlockSpec((NB, Cin, HW), lambda n: (n, 0, 0)),
                pl.BlockSpec((Gout, KK * Cin), lambda n: (0, 0)),
                pl.BlockSpec((KK * Cin, HW), lambda n: (0, 0)),
                pl.BlockSpec((Gout, 1), lambda n: (0, 0)),
            ],
            out_specs=pl.BlockSpec((NB, Cout, HW), lambda n: (n, 0, 0)),
        ),
        compiler_params=pltpu.CompilerParams(
            dimension_semantics=("parallel",),
        ),
    )(x_flat, w2, masks, b_pad)

    # Free metadata-only reshape back to NCHW (no transpose).
    return out_flat.reshape(N, Cout, H, W)


if __name__ == "__main__":
    key = jax.random.PRNGKey(0)
    kx, kwt, kb = jax.random.split(key, 3)

    N, Cin, H, W = 2, 4, 16, 16
    Cout = 3          # classes_num
    K = 3             # kernel_size

    x = jax.random.normal(kx, (N, Cin, H, W), dtype=jnp.float32)
    # Deterministic parameter init (mimics PyTorch's uniform fan-in scaling range).
    fan_in = Cin * K * K
    bound = 1.0 / np.sqrt(fan_in)
    weight = jax.random.uniform(kwt, (Cout, Cin, K, K), minval=-bound, maxval=bound,
                                dtype=jnp.float32)
    bias = jax.random.uniform(kb, (Cout,), minval=-bound, maxval=bound,
                              dtype=jnp.float32)

    out = last_layer_forward(x, weight, bias, kernel_size=K)
    out = jax.block_until_ready(out)

    # Reference: XLA conv with matching numerics (bf16 operands, f32 accumulation),
    # same semantics as nn.Conv2d(padding=1).
    ref = jax.lax.conv_general_dilated(
        x.astype(jnp.bfloat16), weight.astype(jnp.bfloat16),
        window_strides=(1, 1), padding=((1, 1), (1, 1)),
        dimension_numbers=("NCHW", "OIHW", "NCHW"),
        preferred_element_type=jnp.float32,
    ) + bias.reshape(1, Cout, 1, 1)
    np.testing.assert_allclose(np.asarray(out), np.asarray(ref), rtol=1e-4, atol=1e-4)

    print("KERNEL_OK")
</pallas_src>

<mosaic_0001>
module attributes {stable_mosaic.version = 11 : i64} {
  func.func @_conv_im2col_kernel(%arg0: i32, %arg1: memref<1x4x256xf32, #tpu.memory_space<vmem>>, %arg2: memref<8x36xbf16, #tpu.memory_space<vmem>>, %arg3: memref<36x256xf32, #tpu.memory_space<vmem>>, %arg4: memref<8x1xf32, #tpu.memory_space<vmem>>, %arg5: memref<1x3x256xf32, #tpu.memory_space<vmem>>) attributes {dimension_semantics = [#tpu.dimension_semantics<parallel>], iteration_bounds = array<i64: 2>, scalar_prefetch = 0 : i64, scratch_operands = 0 : i64, tpu.core_type = #tpu.core_type<tc>, window_params = [{transform_indices = @transform_0, window_bounds = array<i64: 1, 4, 256>}, {pipeline_mode = #tpu.pipeline_mode<synchronous>, transform_indices = @transform_1, window_bounds = array<i64: 8, 36>}, {pipeline_mode = #tpu.pipeline_mode<synchronous>, transform_indices = @transform_2, window_bounds = array<i64: 36, 256>}, {pipeline_mode = #tpu.pipeline_mode<synchronous>, transform_indices = @transform_3, window_bounds = array<i64: 8, 1>}, {transform_indices = @transform_4, window_bounds = array<i64: 1, 3, 256>}]} {
    %c0 = arith.constant 0 : index
    %c0_0 = arith.constant 0 : index
    %0 = vector.load %arg2[%c0, %c0_0] : memref<8x36xbf16, #tpu.memory_space<vmem>>, vector<8x36xbf16>
    %c0_1 = arith.constant 0 : index
    %c0_2 = arith.constant 0 : index
    %1 = vector.load %arg3[%c0_1, %c0_2] : memref<36x256xf32, #tpu.memory_space<vmem>>, vector<36x256xf32>
    %c0_3 = arith.constant 0 : index
    %c0_4 = arith.constant 0 : index
    %2 = vector.load %arg4[%c0_3, %c0_4] : memref<8x1xf32, #tpu.memory_space<vmem>>, vector<8x1xf32>
    %c0_5 = arith.constant 0 : index
    %c0_6 = arith.constant 0 : index
    %c0_7 = arith.constant 0 : index
    %3 = vector.load %arg1[%c0_5, %c0_6, %c0_7] : memref<1x4x256xf32, #tpu.memory_space<vmem>>, vector<1x4x256xf32>
    %4 = vector.shape_cast %3 : vector<1x4x256xf32> to vector<4x256xf32>
    %c17_i32 = arith.constant 17 : i32
    %5 = tpu.dynamic_rotate %4 by %c17_i32 dim 1 : vector<4x256xf32>, i32 -> vector<4x256xf32>
    %c16_i32 = arith.constant 16 : i32
    %6 = tpu.dynamic_rotate %4 by %c16_i32 dim 1 : vector<4x256xf32>, i32 -> vector<4x256xf32>
    %c15_i32 = arith.constant 15 : i32
    %7 = tpu.dynamic_rotate %4 by %c15_i32 dim 1 : vector<4x256xf32>, i32 -> vector<4x256xf32>
    %c1_i32 = arith.constant 1 : i32
    %8 = tpu.dynamic_rotate %4 by %c1_i32 dim 1 : vector<4x256xf32>, i32 -> vector<4x256xf32>
    %c255_i32 = arith.constant 255 : i32
    %9 = tpu.dynamic_rotate %4 by %c255_i32 dim 1 : vector<4x256xf32>, i32 -> vector<4x256xf32>
    %c241_i32 = arith.constant 241 : i32
    %10 = tpu.dynamic_rotate %4 by %c241_i32 dim 1 : vector<4x256xf32>, i32 -> vector<4x256xf32>
    %c240_i32 = arith.constant 240 : i32
    %11 = tpu.dynamic_rotate %4 by %c240_i32 dim 1 : vector<4x256xf32>, i32 -> vector<4x256xf32>
    %c239_i32 = arith.constant 239 : i32
    %12 = tpu.dynamic_rotate %4 by %c239_i32 dim 1 : vector<4x256xf32>, i32 -> vector<4x256xf32>
    %13 = tpu.concatenate %5, %6, %7, %8, %4, %9, %10, %11, %12 in 0 : vector<4x256xf32>, vector<4x256xf32>, vector<4x256xf32>, vector<4x256xf32>, vector<4x256xf32>, vector<4x256xf32>, vector<4x256xf32>, vector<4x256xf32>, vector<4x256xf32> -> vector<36x256xf32>
    %14 = arith.mulf %13, %1 : vector<36x256xf32>
    %15 = arith.truncf %14 : vector<36x256xf32> to vector<36x256xbf16>
    %cst = arith.constant dense<0.000000e+00> : vector<8x256xf32>
    %16 = tpu.matmul %0, %15, %cst {dimension_numbers = #tpu.dot_dimension_numbers<[1], [0], [0], [1], [0, 0, 1, 1], [], []>} : vector<8x36xbf16>, vector<36x256xbf16>, vector<8x256xf32> -> vector<8x256xf32>
    %17 = vector.broadcast %2 : vector<8x1xf32> to vector<8x256xf32>
    %18 = arith.addf %16, %17 : vector<8x256xf32>
    %19 = vector.extract_strided_slice %18 {offsets = [0, 0], sizes = [3, 256], strides = [1, 1]} : vector<8x256xf32> to vector<3x256xf32>
    %c0_8 = arith.constant 0 : index
    %c0_9 = arith.constant 0 : index
    %c0_10 = arith.constant 0 : index
    %20 = vector.load %arg5[%c0_8, %c0_9, %c0_10] : memref<1x3x256xf32, #tpu.memory_space<vmem>>, vector<1x3x256xf32>
    %21 = vector.shape_cast %20 : vector<1x3x256xf32> to vector<3x256xf32>
    %22 = vector.shape_cast %19 : vector<3x256xf32> to vector<1x3x256xf32>
    tpu.vector_store %arg5[%c0_8, %c0_9, %c0_10], %22 {strides = array<i32>} : memref<1x3x256xf32, #tpu.memory_space<vmem>>, vector<1x3x256xf32>,
    return
  }
  func.func @transform_0(%arg0: i32) -> (i32, i32, i32) {
    %c0_i32 = arith.constant 0 : i32
    %c0_i32_0 = arith.constant 0 : i32
    %c0_i32_1 = arith.constant 0 : i32
    return %arg0, %c0_i32, %c0_i32_0 : i32, i32, i32
  }
  func.func @transform_1(%arg0: i32) -> (i32, i32) {
    %c0_i32 = arith.constant 0 : i32
    %c0_i32_0 = arith.constant 0 : i32
    %c0_i32_1 = arith.constant 0 : i32
    return %c0_i32, %c0_i32_0 : i32, i32
  }
  func.func @transform_2(%arg0: i32) -> (i32, i32) {
    %c0_i32 = arith.constant 0 : i32
    %c0_i32_0 = arith.constant 0 : i32
    %c0_i32_1 = arith.constant 0 : i32
    return %c0_i32, %c0_i32_0 : i32, i32
  }
  func.func @transform_3(%arg0: i32) -> (i32, i32) {
    %c0_i32 = arith.constant 0 : i32
    %c0_i32_0 = arith.constant 0 : i32
    %c0_i32_1 = arith.constant 0 : i32
    return %c0_i32, %c0_i32_0 : i32, i32
  }
  func.func @transform_4(%arg0: i32) -> (i32, i32, i32) {
    %c0_i32 = arith.constant 0 : i32
    %c0_i32_0 = arith.constant 0 : i32
    %c0_i32_1 = arith.constant 0 : i32
    return %arg0, %c0_i32, %c0_i32_0 : i32, i32, i32
  }
}

</mosaic_0001>

<bundles_post_ra>
// kernel: tpu_custom_call.1
= control target key start
LH: loop header
LB: loop body
LE: loop exit
PB: predicated region body
PF: predicated region fallthrough
CT: control target
= control target key end

     0   :  { %9 = vsyncpa [#allocation3], 0  ;;  %s898_s0 = inlined_call_operand.hbm [shape: f32[2,4,256], index: 0, kind: input, shape index: {}]   ;;  %s899_s1 = inlined_call_operand.vmem [shape: bf16[8,36], index: 1, kind: input, shape index: {}]   ;;  %s900_s2 = inlined_call_operand.hbm [shape: f32[36,256], index: 2, kind: input, shape index: {}]   ;;  %s901_s3 = inlined_call_operand.vmem [shape: f32[8,1], index: 3, kind: input, shape index: {}]   ;;  %s902_s4 = inlined_call_operand.vmem [shape: f32[2,3,256], index: 4, kind: output, shape index: {}]  }
   0x1   :  { %11 = vsyncpa [#allocation3 + $0x1], 0 }
   0x2   :  { %12 = vsyncpa [#allocation5], 0  ;;  %s711_s15 = smov 0   ;;  %s713_s16 = smov 0  }
   0x3   :  { %s715_s17 = smov 0   ;;  %s717_s18 = smov 0  }
   0x4 LB: > { %s730_s19 = sadd.s32 4294967295, %s671_s18   ;;  %p38_p0 = scmp.ne.s32.totalorder %s663_s16, %s659_s15  ;;  %s671_s18 = sphi %s717_s18, %s917_s18   ;;  %s667_s17 = sphi %s715_s17, %s916_s17   ;;  %s663_s16 = sphi %s713_s16, %s915_s16   ;;  %s659_s15 = sphi %s711_s15, %s914_s15  }
   0x5   : > { %p903_p1 = scmp.eq.s32.totalorder %s730_s19, 0  ;;  %p495_p2 = scmp.ge.s32.totalorder %s671_s18, 1 }
   0x6   : > { %p138_p3 = scmp.lt.s32.totalorder %s671_s18, 3  ;;  %s673_s22 = smov [#allocation4]  }
   0x7   : > { %p738_p4 = por %p903_p1, %p38_p0  ;;  %s153_s23 = sshll.u32 %s673_s22, 4  ;;  %s154_s23 = int_to_ptr.vmem [resolvable:$true] %s153_s23 }
   0x8   : > { %p742_p5 = pnand %p495_p2, %p138_p3  ;;  %s755_s25 = sadd.s32 1, %s671_s18  }
   0x9   : > { %s906_s20 = scalar_select %p738_p4, 1, 0 }
   0xa   : > { %s907_s21 = scalar_select %p742_p5, 1, 0 }
   0xb   : > { %p518_p6 = pneg %p742_p5  ;;  %s25_s26 = sadd.s32 1, %s667_s17 }
   0xc   : > { %s22_s27 = ssub.s32 %s671_s18, %s755_s25  ;;  %s575_s30 = scalar_lea.hbm %s900_s2, 1280 }
   0xd   : > { %p750_p7 = pnand %p518_p6, %p903_p1  ;;  %p576_p8 = scmp.ne.s32.totalorder %s900_s2, %s575_s30 }
   0xe   : > { %p582_p12 = scmp.lt.u32.totalorder %s575_s30, %s900_s2 }
   0xf   : > { %p577_p9 = pneg %p750_p7 }
  0x11   : > { %p578_p10 = pnand %p577_p9, %p576_p8 }
  0x13   : > { %p579_p11 = pneg %p578_p10 }
  0x15   : > { %p584_p13 = pnand %p582_p12, %p579_p11 }
  0x17   : > { %587 = shalt.err (!%p584_p13)
}
  0x18   : > { %s588_s9 = scalar_lea.vmem %s154_s23, 1280  ;;  %p596_p6 = scmp.lt.s32.totalorder %s154_s23, %s154_s23 }
  0x19   : > { %p589_p0 = scmp.ne.s32.totalorder %s154_s23, %s588_s9  ;;  %p597_p1 = scmp.lt.s32.totalorder %s588_s9, %s588_s9 }
  0x1b   : > { %p591_p2 = pnand %p589_p0, %p577_p9  ;;  %p598_p4 = por %p597_p1, %p596_p6 }
  0x1d   : > { %p592_p3 = pneg %p591_p2 }
  0x1f   : > { %p599_p5 = pnand %p598_p4, %p592_p3 }
  0x21   : > { %602 = shalt.err (!%p599_p5)
}
  0x22   : > { %s674_s10 = smov 256   ;;  %s675_s11 = smov 16  }
  0x23   : > { %521 = dma.hbm_to_vmem [thread:$0]  (!%p750_p7), %s900_s2, 1280, %s154_s23, [#allocation5], %s674_s10, %s674_s10, %s675_s11  }
  0x24   : > { %p23_p8 = scmp.eq.s32.totalorder %s22_s27, 0  ;;  %p32_p9 = scmp.ne.s32.totalorder %s667_s17, %s663_s16 }
  0x25   : > { %p33_p1 = scmp.eq.s32.totalorder %s671_s18, 0  ;;  %p527_p4 = scmp.lt.s32.totalorder %s671_s18, 2 }
  0x26   : > { %s781_s14 = scalar_select %p23_p8, %s667_s17, %s25_s26  }
  0x27   : > { %p34_p5 = por %p33_p1, %p32_p9  ;;  %s170_s15 = sand.u32 1, %s667_s17  }
  0x28   : > { %s498_s22 = sshll.u32 %s170_s15, 3  ;;  %s510_s28 = sshll.u32 %s671_s18, 7 }
  0x29   : > { %s788_s5 = scalar_lea.hbm %s898_s0, %s510_s28  ;;  %s174_s23 = scalar_lea.vmem [#allocation2], %s498_s22 }
  0x2a   : > { %s182_s24 = sshll.u32 %s174_s23, 4  ;;  %p792_p7 = pnand %p527_p4, %p34_p5  ;;  %s790_s24 = int_to_ptr.vmem [resolvable:$true] %s182_s24 }
  0x2b   : > { %s171_s18 = scalar_lea.sflag [#allocation3], %s170_s15  ;;  %s603_s27 = scalar_lea.hbm %s788_s5, 128 }
  0x2c   : > { %p604_p10 = scmp.ne.s32.totalorder %s788_s5, %s603_s27  ;;  %p605_p11 = pneg %p792_p7 }
  0x2d   : > { %s608_s8 = scalar_lea.hbm %s898_s0, 256  ;;  %p609_p0 = scmp.lt.u32.totalorder %s788_s5, %s898_s0 }
  0x2e   : > { %p606_p12 = pnand %p605_p11, %p604_p10  ;;  %p610_p2 = scmp.lt.u32.totalorder %s608_s8, %s603_s27 }
  0x2f   : > { %p612_p6 = scmp.lt.u32.totalorder %s603_s27, %s788_s5 }
  0x30   : > { %p607_p13 = pneg %p606_p12  ;;  %p611_p3 = por %p610_p2, %p609_p0 }
  0x32   : > { %p613_p8 = por %p612_p6, %p611_p3 }
  0x34   : > { %p614_p9 = pnand %p613_p8, %p607_p13 }
  0x36   : > { %617 = shalt.err (!%p614_p9)
}
  0x37   : > { %s618_s11 = scalar_lea.vmem %s790_s24, 128  ;;  %s676_s12 = smov [#allocation2]  }
  0x38   : > { %p619_p1 = scmp.ne.s32.totalorder %s790_s24, %s618_s11  ;;  %s623_s13 = sshll.u32 %s676_s12, 4  ;;  %s624_s13 = int_to_ptr.vmem [resolvable:$false] %s623_s13 }
  0x39   : > { %s625_s15 = scalar_lea.vmem %s624_s13, 256  ;;  %p626_p10 = scmp.lt.s32.totalorder %s790_s24, %s624_s13 }
  0x3a   : > { %p621_p4 = pnand %p619_p1, %p605_p11  ;;  %p627_p12 = scmp.lt.s32.totalorder %s625_s15, %s618_s11 }
  0x3c   : > { %p622_p5 = pneg %p621_p4  ;;  %p628_p0 = por %p627_p12, %p626_p10 }
  0x3e   : > { %p629_p2 = pnand %p628_p0, %p622_p5 }
  0x40   : > { %632 = shalt.err (!%p629_p2)
}
  0x41   : > { %525 = dma.hbm_to_vmem [thread:$0]  (!%p792_p7), %s788_s5, 128, %s790_s24, %s171_s18  }
  0x42   : > { %p910_p13 = scmp.ne.s32.totalorder %s907_s21, 0 }
  0x43   : > { %s193_s22 = sand.u32 (!%p910_p13), 1, %s663_s16   ;;  %p911_p11 = scmp.ne.s32.totalorder (!%p910_p13), %s906_s20, 0 }
  0x44   : > { %191 = sbr.rel (%p910_p13) target bundleno = 451 (0x1c3), region = 36  ;;  %s502_s28 = sshll.u32 (!%p910_p13), %s193_s22, 3 }
  0x45   : > { %s194_s29 = scalar_lea.sflag (!%p910_p13), [#allocation3], %s193_s22  ;;  %s197_s30 = scalar_lea.vmem (!%p910_p13), [#allocation2], %s502_s28 }
  0x4b   : > { %650 = dma.done.wait (%p911_p11), %s194_s29, 128  }
  0x4c   : > { %652 = vsyncadd (%p911_p11), %s194_s29, 4294967168  ;;  %p912_p3 = scmp.eq.s32.totalorder %s730_s19, 0 }
  0x4e   : > { %654 = dma.done.wait (%p912_p3), [#allocation5], 1280   ;;  %p913_p6 = pmov %p912_p3 }
  0x4f   : > { %v832_v0 = vld [vmem:[%s197_s30] sm:$0xff]  ;;  %s677_s21 = smov 1   ;;  %s678_s5 = smov 16   ;;  %v683_v2 = vmov 0   ;;  %v252_v4 = vlaneseq  ;;  %vm330_vm3 = vcmask 1043456   ;;  %v234_v20 = vld [vmem:[#allocation4 + $0x8] sm:$0xff] }
  0x50   : > { %656 = vsyncadd (%p913_p6), [#allocation5], 4294966016  ;;  %271 = vrot.lane.b32.xlu1 %v832_v0, %s677_s21  ;;  %257 = vrot.lane.b32.xlu0 %v832_v0, %s678_s5  ;;  %v838_v1 = vcombine.high %v832_v0, %v832_v0  ;;  %s679_s20 = smov 17   ;;  %s680_s23 = smov 15   ;;  %v243_v3 = vld [vmem:[%s901_s3] sm:$0xff]  ;;  %v236_v25 = vld [vmem:[#allocation4 + $0x18] sm:$0xff] }
  0x51   : > { %s681_s24 = smov 127   ;;  %s682_s26 = smov 112   ;;  %403 = vmatprep.mubr.bf16.mxu0 %v683_v2  ;;  %573 = vset.pattern.permute.xlu0 %v683_v2  ;;  %v857_v7 = vand.u32 127, %v252_v4  ;;  %v233_v27 = vld [vmem:[#allocation4] sm:$0xff]  ;;  %v235_v28 = vld [vmem:[#allocation4 + $0x10] sm:$0xff]  ;;  %v238_v50 = vld [vmem:[#allocation4 + $0x28] sm:$0xff] }
  0x52   : > { %s684_s18 = smov 113   ;;  %s685_s27 = smov 111   ;;  %v239_v57 = vld [vmem:[#allocation4 + $0x30] sm:$0xff]  ;;  %v240_v58 = vld [vmem:[#allocation4 + $0x38] sm:$0xff]  ;;  %v237_v59 = vld [vmem:[#allocation4 + $0x20] sm:$0xff]  ;;  %vm364_vm9 = vcmask 1041408  }
  0x53   : > { %vm275_vm0 = vcmp.lt.s32.totalorder %v857_v7, 1  ;;  %vm261_vm1 = vcmp.lt.s32.totalorder %v857_v7, 16  ;;  %vm254_vm2 = vcmp.lt.s32.totalorder %v857_v7, 17  ;;  %vm268_vm4 = vcmp.lt.s32.totalorder %v857_v7, 15  ;;  %v242_v4 = vld [vmem:[#allocation4 + $0x48] sm:$0xf] }
  0x54   : > { %248 = vrot.lane.b32.xlu0 %v832_v0, %s679_s20  ;;  %273 = vrot.lane.b32.xlu1 %v838_v1, %s677_s21  ;;  %vm282_vm5 = vcmp.lt.s32.totalorder %v857_v7, 127  ;;  %vm296_vm6 = vcmp.lt.s32.totalorder %v857_v7, 112  ;;  %vm289_vm7 = vcmp.lt.s32.totalorder %v857_v7, 113  ;;  %vm303_vm8 = vcmp.lt.s32.totalorder %v857_v7, 111  ;;  %p226_p7 = scmp.lt.s32.totalorder %s730_s19, 1 }
  0x55   : > { %vm360_vm10 = vcmask 293888  }
  0x56   : > { %s919_s19 = smov (!%p226_p7, %s730_s19), 1 }
  0x57   : > { %s511_s10 = sshll.u32 %s919_s19, 3 }
  0x58   : > { %250 = vrot.lane.b32.xlu1 %v838_v1, %s679_s20  ;;  %259 = vrot.lane.b32.xlu0 %v838_v1, %s678_s5  ;;  %s230_s13 = scalar_lea.vmem %s902_s4, %s511_s10 }
  0x5c   : > { %266 = vrot.lane.b32.xlu1 %v838_v1, %s680_s23  ;;  %264 = vrot.lane.b32.xlu0 %v832_v0, %s680_s23 }
  0x60   : > { %280 = vrot.lane.b32.xlu1 %v838_v1, %s681_s24  ;;  %278 = vrot.lane.b32.xlu0 %v832_v0, %s681_s24 }
  0x64   : > { %294 = vrot.lane.b32.xlu1 %v838_v1, %s682_s26  ;;  %292 = vrot.lane.b32.xlu0 %v832_v0, %s682_s26 }
  0x68   : > { %287 = vrot.lane.b32.xlu1 %v838_v1, %s684_s18  ;;  %285 = vrot.lane.b32.xlu0 %v832_v0, %s684_s18 }
  0x6c   : > { %301 = vrot.lane.b32.xlu1 %v838_v1, %s685_s27  ;;  %299 = vrot.lane.b32.xlu0 %v832_v0, %s685_s27 }
  0x70   : > { %357 = vperm.xlu0 %573, %v243_v3   ;;  %v241_v3 = vld [vmem:[#allocation4 + $0x40] sm:$0xf] }
  0xc2   : > { %v272_v5 = vpop.permute.xlu1 %271  ;;  %v258_v6 = vpop.permute.xlu0 %257 }
  0xc6   : > { %v249_v8 = vpop.permute.xlu0 %248  ;;  %v274_v9 = vpop.permute.xlu1 %273 }
  0xc7   : > { %v276_v12 = vsel %vm275_vm0, %v272_v5, %v274_v9  ;;  %v277_v13 = vsel %vm275_vm0, %v274_v9, %v272_v5 }
  0xc8   : > { %v314_v21 = vrot.slane %v277_v13, 4  ;;  %v315_v22 = vrot.slane %v276_v12, 4 }
  0xca   : > { %v251_v10 = vpop.permute.xlu1 %250  ;;  %v260_v11 = vpop.permute.xlu0 %259 }
  0xcb   : > { %v262_v14 = vsel %vm261_vm1, %v258_v6, %v260_v11  ;;  %v263_v15 = vsel %vm261_vm1, %v260_v11, %v258_v6  ;;  %v255_v18 = vsel %vm254_vm2, %v249_v8, %v251_v10  ;;  %v256_v19 = vsel %vm254_vm2, %v251_v10, %v249_v8 }
  0xcc   : > { %v308_v16 = vrot.slane %v263_v15, 4  ;;  %v309_v17 = vrot.slane %v262_v14, 4 }
  0xce   : > { %v267_v23 = vpop.permute.xlu1 %266  ;;  %v265_v24 = vpop.permute.xlu0 %264  ;;  %v332_v26 = vsel %vm330_vm3, %v255_v18, %v309_v17  ;;  %v331_v29 = vsel %vm330_vm3, %v256_v19, %v308_v16  ;;  %v232_v17 = vld [vmem:[%s899_s1] sm:$0xf] }
  0xcf   : > { %v269_v30 = vsel %vm268_vm4, %v265_v24, %v267_v23  ;;  %v270_v31 = vsel %vm268_vm4, %v267_v23, %v265_v24  ;;  %v340_v34 = vmul.f32 %v332_v26, %v234_v20  ;;  %v339_v36 = vmul.f32 %v331_v29, %v233_v27 }
  0xd0   : > { %v333_v32 = vsel %vm330_vm3, %v270_v31, %v314_v21  ;;  %v334_v33 = vsel %vm330_vm3, %v269_v30, %v315_v22 }
  0xd1   : > { %v342_v35 = vmul.f32 %v334_v33, %v236_v25  ;;  %v341_v37 = vmul.f32 %v333_v32, %v235_v28 }
  0xd2   : > { %v281_v38 = vpop.permute.xlu1 %280  ;;  %v279_v39 = vpop.permute.xlu0 %278 }
  0xd3   : > { %v283_v40 = vsel %vm282_vm5, %v279_v39, %v281_v38  ;;  %v284_v41 = vsel %vm282_vm5, %v281_v38, %v279_v39  ;;  %v350_v42 = vpack.c.bf16 %v342_v35, %v340_v34  ;;  %v349_v43 = vpack.c.bf16 %v341_v37, %v339_v36 }
  0xd4   : > { %v320_v44 = vrot.slane %v283_v40, 4  ;;  %v321_v45 = vrot.slane %v284_v41, 4 }
  0xd5   : > { %371 = vmatprep.subr.bf16.mxu0 %v350_v42 }
  0xd6   : > { %v295_v46 = vpop.permute.xlu1 %294  ;;  %v293_v47 = vpop.permute.xlu0 %292  ;;  %372 = vmatpush1.bf16.msra.mxu0 %v349_v43  ;;  %v335_v51 = vsel %vm330_vm3, %v832_v0, %v320_v44  ;;  %v336_v52 = vsel %vm330_vm3, %v838_v1, %v321_v45 }
  0xd7   : > { %v297_v48 = vsel %vm296_vm6, %v293_v47, %v295_v46  ;;  %v298_v49 = vsel %vm296_vm6, %v295_v46, %v293_v47  ;;  %v344_v1 = vmul.f32 %v336_v52, %v238_v50  ;;  %v343_v5 = vmul.f32 %v335_v51, %v237_v59 }
  0xd8   : > { %v326_v53 = vrot.slane %v297_v48, 4  ;;  %v327_v54 = vrot.slane %v298_v49, 4 }
  0xda   : > { %v288_v55 = vpop.permute.xlu1 %287  ;;  %v286_v56 = vpop.permute.xlu0 %285 }
  0xdb   : > { %v290_v60 = vsel %vm289_vm7, %v286_v56, %v288_v55  ;;  %v291_v61 = vsel %vm289_vm7, %v288_v55, %v286_v56 }
  0xdc   : > { %v337_v62 = vsel %vm330_vm3, %v290_v60, %v326_v53  ;;  %v338_v63 = vsel %vm330_vm3, %v291_v61, %v327_v54 }
  0xdd   : > { %v345_v2 = vmul.f32 %v337_v62, %v239_v57  ;;  %v346_v0 = vmul.f32 %v338_v63, %v240_v58 }
  0xde   : > { %v302_v6 = vpop.permute.xlu1 %301  ;;  %v300_v8 = vpop.permute.xlu0 %299 }
  0xdf   : > { %v304_v9 = vsel %vm303_vm8, %v300_v8, %v302_v6  ;;  %v305_v10 = vsel %vm303_vm8, %v302_v6, %v300_v8  ;;  %v352_v11 = vpack.c.bf16 %v346_v0, %v344_v1  ;;  %v351_v12 = vpack.c.bf16 %v345_v2, %v343_v5 }
  0xe0   : > { %v347_v13 = vmul.f32 %v304_v9, %v241_v3  ;;  %v348_v14 = vmul.f32 %v305_v10, %v242_v4 }
  0xe1   : > { %373 = vmatprep.subr.bf16.mxu0 %v352_v11 }
  0xe2   : > { %v353_v15 = vpack.c.bf16 %v347_v13, %v347_v13  ;;  %v354_v7 = vpack.c.bf16 %v348_v14, %v348_v14  ;;  %374 = vmatpush1.bf16.msra.mxu0 %v351_v12 }
  0xe4   : > { %506 = vmatprep.subr.msk.bf16.mxu0 %vm364_vm9, %v354_v7  ;;  %v366_v16 = vsel %vm364_vm9, %v353_v15, 0 }
  0xe6   : > { %376 = vmatpush1.bf16.msra.mxu0 %v366_v16 }
  0xe9   : > { %507 = vmatmul.mubr.msk.bf16.vlgmr.msra.gmra.mrb[0].mxu0 %vm360_vm10, %v232_v17 }
  0xef   : > { %v358_v18 = vpop.permute.xlu0 %357 }
 0x1bc   : > { %v405_v19 = vpop.f32.mrb[0].mxu0 }
 0x1bd   : > { %v406_v20 = vadd.f32 %v405_v19, %v358_v18  ;;  %v407_v21 = vpop.f32.mrb[1].mxu0 }
 0x1be   : > { %v408_v22 = vadd.f32 %v407_v21, %v358_v18  ;;  %v409_v23 = vpop.f32.mrb[2].mxu0 }
 0x1bf   : > { %v410_v24 = vpop.f32.mrb[3].mxu0 }
 0x1c0   : > { %v414_v25 = vcombine.low %v406_v20, %v408_v22 }
 0x1c2   : > { %416 = vst [vmem:[%s230_s13] sm:$0x77] %v414_v25 }
 0x1c3 PF: > { %p15_p8 = scmp.ge.s32.totalorder %s755_s25, 4   ;;  %s914_s15 = smov %s663_s16 }
 0x1c4   : > { %s915_s16 = smov %s667_s17  ;;  %s916_s17 = smov %s781_s14 }
 0x1c5   : > { %s917_s18 = smov %s755_s25  ;;  %17 = sbr.rel (!%p15_p8) target bundleno = 4 (0x4), region = 80 }
 0x1cc   :  { %438 = vsyncpa [#allocation3], 1 }
 0x1cd   :  { %440 = vsyncpa [#allocation3 + $0x1], 1 }
 0x1ce   :  { %441 = vsyncpa [#allocation5], 1 }

</bundles_post_ra>
